<compile_context>
chip_gen: v7x
topology: tpu7x:2x2x1
jax: 0.10.0
libtpu: 0.0.40
codegen_flags: <defaults>
</compile_context>

<pallas_src>
import jax
import jax.numpy as jnp
from jax.experimental import pallas as pl
from jax.experimental.pallas import tpu as pltpu


def _invconv_kernel(w_ref, x_ref, o_ref):
    # w_ref: (C, C)  x_ref: (C, T)  o_ref: (C, T)
    # 1x1 conv over channels: out = W @ x  (spatial on the lane axis, no transpose)
    o_ref[...] = jnp.dot(
        w_ref[...], x_ref[...], preferred_element_type=jnp.float32
    ).astype(o_ref.dtype)


def _pick_spatial_tile(C, hw, itemsize, budget_bytes=24 << 20, max_tile=8192):
    """Largest multiple-of-128 spatial tile whose double-buffered working set
    (2x input tile + 2x output tile + resident CxC weight) fits the budget.
    Budget of 24 MiB keeps the kernel safe even on v7x's 64 MiB VMEM."""
    hw128 = ((hw + 127) // 128) * 128
    t = max(128, min(max_tile, hw128) // 128 * 128)
    per_col = 4 * C * itemsize  # 2 in bufs + 2 out bufs per spatial column
    while t > 128 and per_col * t + C * C * itemsize > budget_bytes:
        t -= 128
    return t


def invconv2d_apply(x_nchw, weight):
    """out[n, o, h, w] = sum_i weight[o, i] * x[n, i, h, w] via Pallas matmul."""
    N, C, H, W = x_nchw.shape
    HW = H * W
    itemsize = jnp.dtype(x_nchw.dtype).itemsize
    t = _pick_spatial_tile(C, HW, itemsize)

    # (N, C, H, W) -> (N, C, HW); pad the spatial axis to a multiple of the tile
    # (padding columns are zeros -> produce zeros, sliced off afterwards).
    x3d = x_nchw.reshape(N, C, HW)
    hw_pad = pl.cdiv(HW, t) * t
    if hw_pad != HW:
        x3d = jnp.pad(x3d, ((0, 0), (0, 0), (0, hw_pad - HW)))

    grid = (N, hw_pad // t)
    # Raise the scoped VMEM limit enough for the chosen tile (capped well under
    # v7x's 64 MiB physical VMEM).
    vmem_limit = int(min(max((4 * C * t + C * C) * itemsize * 2, 32 << 20), 48 << 20))

    out3d = pl.pallas_call(
        _invconv_kernel,
        out_shape=jax.ShapeDtypeStruct((N, C, hw_pad), x_nchw.dtype),
        grid_spec=pltpu.PrefetchScalarGridSpec(
            num_scalar_prefetch=0,
            grid=grid,
            in_specs=[
                # Weight: full CxC block, constant index -> stays resident in VMEM.
                pl.BlockSpec((C, C), lambda n, j: (0, 0)),
                # Input: batch dim squeezed, channels full, spatial tiled (lane axis).
                pl.BlockSpec((None, C, t), lambda n, j: (n, 0, j)),
            ],
            out_specs=pl.BlockSpec((None, C, t), lambda n, j: (n, 0, j)),
        ),
        compiler_params=pltpu.CompilerParams(
            dimension_semantics=("parallel", "parallel"),
            vmem_limit_bytes=vmem_limit,
        ),
    )(weight, x3d)

    if hw_pad != HW:
        out3d = out3d[:, :, :HW]
    return out3d.reshape(N, C, H, W)


def invconv2d_forward(x_nchw, weight):
    """Forward pass of InvConv2d.

    x_nchw: (N, C, H, W) float32
    weight: (C, C) float32 (the squeezed 1x1 conv weight, weight[out_ch, in_ch])
    returns (out_nchw, logdet)
    """
    _, _, H, W = x_nchw.shape
    out = invconv2d_apply(x_nchw, weight)
    # TODO(synk): PyTorch computes slogdet in float64; JAX (x64 disabled) does it
    # in float32 here — tiny CxC op kept in plain JAX (no Pallas pivoted-LU).
    logdet = (H * W) * jnp.linalg.slogdet(weight)[1].astype(jnp.float32)
    return out, logdet


def make_weight(in_channel, key):
    """Deterministic init matching the module: QR of a random normal matrix."""
    w = jax.random.normal(key, (in_channel, in_channel), dtype=jnp.float32)
    q, _ = jnp.linalg.qr(w)
    return q  # (C, C); the (C, C, 1, 1) unsqueeze is implicit in our matmul


if __name__ == "__main__":
    key = jax.random.PRNGKey(0)
    k_w, k_x, k_x2 = jax.random.split(key, 3)

    N, C, H, W = 2, 4, 16, 16
    weight = make_weight(C, k_w)                      # (C, C)
    x = jax.random.normal(k_x, (N, C, H, W), dtype=jnp.float32)

    out, logdet = invconv2d_forward(x, weight)
    out = jax.block_until_ready(out)
    logdet = jax.block_until_ready(logdet)

    # Reference check (plain JAX 1x1 conv = einsum over channels)
    ref = jnp.einsum("oi,nihw->nohw", weight, x)
    assert out.shape == (N, C, H, W)
    assert jnp.allclose(out, ref, atol=1e-5, rtol=1e-5)
    ref_logdet = (H * W) * jnp.linalg.slogdet(weight)[1]
    assert jnp.allclose(logdet, ref_logdet, atol=1e-4, rtol=1e-4)

    # Tail path: spatial size not a multiple of the 128-lane tile (pads to 128).
    x2 = jax.random.normal(k_x2, (N, C, 5, 7), dtype=jnp.float32)
    out2, _ = invconv2d_forward(x2, weight)
    out2 = jax.block_until_ready(out2)
    ref2 = jnp.einsum("oi,nihw->nohw", weight, x2)
    assert jnp.allclose(out2, ref2, atol=1e-5, rtol=1e-5)

    print("KERNEL_OK")
</pallas_src>

<mosaic_0001>
module attributes {stable_mosaic.version = 11 : i64} {
  func.func @_invconv_kernel(%arg0: i32, %arg1: i32, %arg2: memref<4x4xf32, #tpu.memory_space<vmem>>, %arg3: memref<1x4x256xf32, #tpu.memory_space<vmem>>, %arg4: memref<1x4x256xf32, #tpu.memory_space<vmem>>) attributes {dimension_semantics = [#tpu.dimension_semantics<parallel>, #tpu.dimension_semantics<parallel>], iteration_bounds = array<i64: 2, 1>, scalar_prefetch = 0 : i64, scratch_operands = 0 : i64, tpu.core_type = #tpu.core_type<tc>, window_params = [{pipeline_mode = #tpu.pipeline_mode<synchronous>, transform_indices = @transform_0, window_bounds = array<i64: 4, 4>}, {transform_indices = @transform_1, window_bounds = array<i64: 1, 4, 256>}, {transform_indices = @transform_2, window_bounds = array<i64: 1, 4, 256>}]} {
    %c0 = arith.constant 0 : index
    %c0_0 = arith.constant 0 : index
    %0 = vector.load %arg2[%c0, %c0_0] : memref<4x4xf32, #tpu.memory_space<vmem>>, vector<4x4xf32>
    %c0_1 = arith.constant 0 : index
    %c0_2 = arith.constant 0 : index
    %c0_3 = arith.constant 0 : index
    %1 = vector.load %arg3[%c0_1, %c0_2, %c0_3] : memref<1x4x256xf32, #tpu.memory_space<vmem>>, vector<1x4x256xf32>
    %2 = vector.shape_cast %1 : vector<1x4x256xf32> to vector<4x256xf32>
    %cst = arith.constant dense<0.000000e+00> : vector<4x256xf32>
    %3 = tpu.matmul %0, %2, %cst {dimension_numbers = #tpu.dot_dimension_numbers<[1], [0], [0], [1], [0, 0, 1, 1], [], []>} : vector<4x4xf32>, vector<4x256xf32>, vector<4x256xf32> -> vector<4x256xf32>
    %c0_4 = arith.constant 0 : index
    %c0_5 = arith.constant 0 : index
    %c0_6 = arith.constant 0 : index
    %4 = vector.load %arg4[%c0_4, %c0_5, %c0_6] : memref<1x4x256xf32, #tpu.memory_space<vmem>>, vector<1x4x256xf32>
    %5 = vector.shape_cast %4 : vector<1x4x256xf32> to vector<4x256xf32>
    %6 = vector.shape_cast %3 : vector<4x256xf32> to vector<1x4x256xf32>
    tpu.vector_store %arg4[%c0_4, %c0_5, %c0_6], %6 {strides = array<i32>} : memref<1x4x256xf32, #tpu.memory_space<vmem>>, vector<1x4x256xf32>,
    return
  }
  func.func @transform_0(%arg0: i32, %arg1: i32) -> (i32, i32) {
    %c0_i32 = arith.constant 0 : i32
    %c0_i32_0 = arith.constant 0 : i32
    %c0_i32_1 = arith.constant 0 : i32
    return %c0_i32, %c0_i32_0 : i32, i32
  }
  func.func @transform_1(%arg0: i32, %arg1: i32) -> (i32, i32, i32) {
    %c0_i32 = arith.constant 0 : i32
    %c0_i32_0 = arith.constant 0 : i32
    return %arg0, %c0_i32, %arg1 : i32, i32, i32
  }
  func.func @transform_2(%arg0: i32, %arg1: i32) -> (i32, i32, i32) {
    %c0_i32 = arith.constant 0 : i32
    %c0_i32_0 = arith.constant 0 : i32
    return %arg0, %c0_i32, %arg1 : i32, i32, i32
  }
}

</mosaic_0001>

<bundles_post_ra>
// kernel: tpu_custom_call.1
= control target key start
LH: loop header
LB: loop body
LE: loop exit
PB: predicated region body
PF: predicated region fallthrough
CT: control target
= control target key end

     0   :  { %7 = vsyncpa [#allocation3], 0  ;;  %s873_s0 = inlined_call_operand.hbm [shape: f32[4,4], index: 0, kind: input, shape index: {}]   ;;  %s874_s1 = inlined_call_operand.hbm [shape: f32[2,4,256], index: 1, kind: input, shape index: {}]   ;;  %s875_s2 = inlined_call_operand.hbm [shape: f32[2,4,256], index: 2, kind: output, shape index: {}]  }
   0x1   :  { %8 = vsyncpa [#allocation6], 0 }
   0x2   :  { %10 = vsyncpa [#allocation6 + $0x1], 0 }
   0x3   :  { %11 = vsyncpa [#allocation4], 0 }
   0x4   :  { %13 = vsyncpa [#allocation4 + $0x1], 0  ;;  %s657_s9 = smov 0   ;;  %s659_s10 = smov 0  }
   0x5   :  { %s661_s11 = smov 0   ;;  %s663_s12 = smov 0  }
   0x6   :  { %s665_s13 = smov 0   ;;  %s667_s14 = smov 0  }
   0x7 LB: > { %s395_s15 = sadd.s32 4294967295, %s636_s14   ;;  %s396_s16 = sadd.s32 4294967294, %s636_s14   ;;  %s636_s14 = sphi %s667_s14, %s19_s14   ;;  %s632_s13 = sphi %s665_s13, %s900_s13   ;;  %s628_s12 = sphi %s663_s12, %s899_s12   ;;  %s624_s11 = sphi %s661_s11, %s898_s11   ;;  %s620_s10 = sphi %s659_s10, %s897_s10   ;;  %s616_s9 = sphi %s657_s9, %s896_s9  }
   0x8   : > { %p74_p0 = scmp.ne.s32.totalorder %s620_s10, %s616_s9  ;;  %p691_p1 = scmp.eq.s32.totalorder %s395_s15, 0 }
   0x9   : > { %p695_p2 = scmp.eq.s32.totalorder %s395_s15, 1  ;;  %p106_p3 = scmp.eq.s32.totalorder %s396_s16, 1 }
   0xa   : > { %s880_s17 = scalar_select %p691_p1, 1, 0 }
   0xb   : > { %s881_s18 = scalar_select %p695_p2, 1, 0 }
   0xc   : > { %p701_p4 = por %p691_p1, %p74_p0  ;;  %p397_p5 = scmp.ge.s32.totalorder %s636_s14, 1 }
   0xd   : > { %p706_p6 = por %p106_p3, %p74_p0  ;;  %p113_p7 = scmp.lt.s32.totalorder %s636_s14, 3 }
   0xe   : > { %s882_s19 = scalar_select %p701_p4, 1, 0 }
   0xf   : > { %s883_s20 = scalar_select %p706_p6, 1, 0 }
  0x10   : > { %p711_p8 = pnand %p397_p5, %p113_p7  ;;  %s638_s22 = smov [#allocation2]  }
  0x11   : > { %s126_s23 = sshll.u32 %s638_s22, 4  ;;  %s31_s25 = sadd.s32 1, %s632_s13  ;;  %s127_s23 = int_to_ptr.vmem [resolvable:$true] %s126_s23 }
  0x12   : > { %s884_s21 = scalar_select %p711_p8, 1, 0 }
  0x13   : > { %p425_p10 = pneg %p711_p8  ;;  %s61_s26 = sadd.s32 1, %s624_s11 }
  0x14   : > { %p726_p12 = scmp.ge.s32.totalorder %s31_s25, 2  ;;  %s492_s30 = scalar_lea.hbm %s873_s0, 64 }
  0x15   : > { %p720_p11 = pnand %p425_p10, %p691_p1  ;;  %p493_p13 = scmp.ne.s32.totalorder %s873_s0, %s492_s30 }
  0x16   : > { %s886_s27 = scalar_select %p726_p12, 1, 0 }
  0x17   : > { %p494_p0 = pneg %p720_p11  ;;  %p499_p7 = scmp.lt.u32.totalorder %s492_s30, %s873_s0 }
  0x19   : > { %p495_p3 = pnand %p494_p0, %p493_p13 }
  0x1b   : > { %p496_p5 = pneg %p495_p3 }
  0x1d   : > { %p501_p10 = pnand %p499_p7, %p496_p5 }
  0x1f   : > { %504 = shalt.err (!%p501_p10)
}
  0x20   : > { %s505_s7 = scalar_lea.vmem %s127_s23, 64  ;;  %p513_p1 = scmp.lt.s32.totalorder %s127_s23, %s127_s23 }
  0x21   : > { %p506_p9 = scmp.ne.s32.totalorder %s127_s23, %s505_s7  ;;  %p514_p8 = scmp.lt.s32.totalorder %s505_s7, %s505_s7 }
  0x23   : > { %p508_p6 = pnand %p506_p9, %p494_p0  ;;  %p515_p2 = por %p514_p8, %p513_p1 }
  0x25   : > { %p509_p4 = pneg %p508_p6 }
  0x27   : > { %p516_p12 = pnand %p515_p2, %p509_p4 }
  0x29   : > { %519 = shalt.err (!%p516_p12)
}
  0x2a   : > { %428 = dma.hbm_to_vmem [thread:$0]  (!%p720_p11), %s873_s0, 64, %s127_s23, [#allocation3]  }
  0x2b   : > { %p887_p1 = scmp.ne.s32.totalorder %s886_s27, 0  ;;  %p68_p2 = scmp.ne.s32.totalorder %s624_s11, %s620_s10 }
  0x2c   : > { %p69_p4 = scmp.eq.s32.totalorder %s636_s14, 0  ;;  %p438_p6 = scmp.lt.s32.totalorder %s636_s14, 2 }
  0x2d   : > { %s902_s25 = smov (%p887_p1, %s31_s25), 0  ;;  %p888_p12 = scmp.ne.s32.totalorder %s881_s18, 0 }
  0x2e   : > { %s56_s16 = ssub.s32 %s632_s13, %s902_s25  ;;  %p70_p9 = por %p69_p4, %p68_p2 }
  0x2f   : > { %p59_p8 = scmp.eq.s32.totalorder %s56_s16, 0  ;;  %p758_p13 = por %p888_p12, %p68_p2 }
  0x30   : > { %s137_s24 = sand.u32 1, %s624_s11   ;;  %s415_s27 = sshll.u32 %s632_s13, 7 }
  0x31   : > { %s766_s28 = scalar_select %p59_p8, %s624_s11, %s61_s26  }
  0x32   : > { %s400_s23 = sshll.u32 %s137_s24, 3  ;;  %s772_s3 = scalar_lea.hbm %s874_s1, %s415_s27 }
  0x33   : > { %s141_s18 = scalar_lea.vmem [#allocation5], %s400_s23  ;;  %p776_p11 = pnand %p438_p6, %p70_p9 }
  0x34   : > { %s151_s4 = sshll.u32 %s141_s18, 4  ;;  %s138_s26 = scalar_lea.sflag [#allocation6], %s137_s24  ;;  %s774_s4 = int_to_ptr.vmem [resolvable:$true] %s151_s4 }
  0x35   : > { %s520_s6 = scalar_lea.hbm %s772_s3, 128  ;;  %p522_p3 = pneg %p776_p11 }
  0x36   : > { %p521_p0 = scmp.ne.s32.totalorder %s772_s3, %s520_s6  ;;  %s525_s15 = scalar_lea.hbm %s874_s1, 256 }
  0x37   : > { %p526_p10 = scmp.lt.u32.totalorder %s772_s3, %s874_s1  ;;  %p527_p1 = scmp.lt.u32.totalorder %s525_s15, %s520_s6 }
  0x38   : > { %p523_p5 = pnand %p522_p3, %p521_p0  ;;  %p529_p4 = scmp.lt.u32.totalorder %s520_s6, %s772_s3 }
  0x39   : > { %p528_p2 = por %p527_p1, %p526_p10 }
  0x3a   : > { %p524_p7 = pneg %p523_p5 }
  0x3b   : > { %p530_p6 = por %p529_p4, %p528_p2 }
  0x3d   : > { %p531_p8 = pnand %p530_p6, %p524_p7 }
  0x3f   : > { %534 = shalt.err (!%p531_p8)
}
  0x40   : > { %s535_s24 = scalar_lea.vmem %s774_s4, 128  ;;  %s639_s27 = smov [#allocation5]  }
  0x41   : > { %p536_p9 = scmp.ne.s32.totalorder %s774_s4, %s535_s24  ;;  %s540_s29 = sshll.u32 %s639_s27, 4  ;;  %s541_s29 = int_to_ptr.vmem [resolvable:$false] %s540_s29 }
  0x42   : > { %s542_s30 = scalar_lea.vmem %s541_s29, 256  ;;  %p543_p5 = scmp.lt.s32.totalorder %s774_s4, %s541_s29 }
  0x43   : > { %p538_p12 = pnand %p536_p9, %p522_p3  ;;  %p544_p10 = scmp.lt.s32.totalorder %s542_s30, %s535_s24 }
  0x45   : > { %p539_p0 = pneg %p538_p12  ;;  %p545_p1 = por %p544_p10, %p543_p5 }
  0x47   : > { %p546_p2 = pnand %p545_p1, %p539_p0 }
  0x49   : > { %549 = shalt.err (!%p546_p2)
}
  0x4a   : > { %432 = dma.hbm_to_vmem [thread:$0]  (!%p776_p11), %s772_s3, 128, %s774_s4, %s138_s26  }
  0x4b   : > { %p891_p7 = scmp.ne.s32.totalorder %s884_s21, 0 }
  0x4c   : > { %p892_p3 = scmp.ne.s32.totalorder (!%p891_p7), %s880_s17, 0 }
  0x4d   : > { %160 = sbr.rel (%p891_p7) target bundleno = 323 (0x143), region = 28 }
  0x54   : > { %603 = dma.done.wait (%p892_p3), [#allocation3], 64  }
  0x55   : > { %605 = vsyncadd (%p892_p3), [#allocation3], 4294967232  ;;  %s812_s18 = sand.u32 1, %s620_s10   ;;  %p893_p4 = scmp.ne.s32.totalorder %s882_s19, 0 }
  0x56   : > { %s405_s6 = sshll.u32 %s812_s18, 3  ;;  %s167_s5 = scalar_lea.sflag [#allocation6], %s812_s18 }
  0x57   : > { %s170_s7 = scalar_lea.vmem [#allocation5], %s405_s6 }
  0x58   : > { %607 = dma.done.wait (%p893_p4), %s167_s5, 128  }
  0x59   : > { %609 = vsyncadd (%p893_p4), %s167_s5, 4294967168  ;;  %v640_v0 = vmov 0.0   ;;  %v194_v1 = vld [vmem:[%s170_s7] sm:$0xff]  ;;  %vm201_vm0 = vcmask 1043456   ;;  %v193_v3 = vld [vmem:[#allocation2] sm:$0xf] }
  0x5a   : > { %270 = vmatprep.mubr.f32.mxu0 %v640_v0  ;;  %v196_v2 = vcombine.high %v194_v1, %v194_v1  ;;  %vm197_vm1 = vcmask 31744   ;;  %s416_s17 = sshll.u32 %s628_s12, 7  ;;  %s190_s21 = scalar_lea.vmem [#allocation7], %s405_s6 }
  0x5b   : > { %s299_s3 = sshll.u32 %s190_s21, 4  ;;  %s824_s26 = scalar_lea.hbm %s875_s2, %s416_s17  ;;  %s826_s3 = int_to_ptr.vmem [resolvable:$true] %s299_s3 }
  0x5c   : > { %407 = vmatprep.subr.msk.mxu0 %vm201_vm0, %v196_v2  ;;  %s283_s8 = scalar_lea.sflag [#allocation4], %s812_s18  ;;  %s550_s15 = scalar_lea.vmem %s826_s3, 128 }
  0x5d   : > { %408 = vmatpush1.msk.msra.mxu0 %vm201_vm0, %v194_v1  ;;  %p551_p11 = scmp.ne.s32.totalorder %s826_s3, %s550_s15  ;;  %s641_s12 = smov [#allocation7]  }
  0x5e   : > { %409 = vmatmul.mubr.msk.f32.vlgmr.msra.gmra.mrb[0].mxu0 %vm197_vm1, %v193_v3  ;;  %s554_s16 = sshll.u32 %s641_s12, 4  ;;  %s555_s16 = int_to_ptr.vmem [resolvable:$false] %s554_s16 }
  0x5f   : > { %p552_p6 = pnand %p551_p11, %p758_p13  ;;  %s556_s23 = scalar_lea.vmem %s555_s16, 256 }
  0x60   : > { %p557_p9 = scmp.lt.s32.totalorder %s826_s3, %s555_s16  ;;  %p558_p12 = scmp.lt.s32.totalorder %s556_s23, %s550_s15 }
  0x61   : > { %p553_p8 = pneg %p552_p6 }
  0x62   : > { %p559_p0 = por %p558_p12, %p557_p9 }
  0x64   : > { %p560_p5 = pnand %p559_p0, %p553_p8 }
 0x131   : > { %v272_v4 = vpop.f32.mrb[0].mxu0 }
 0x132   : > { %v274_v5 = vpop.f32.mrb[1].mxu0 }
 0x133   : > { %v279_v6 = vcombine.low %v272_v4, %v274_v5 }
 0x135   : > { %281 = vst [vmem:[%s190_s21] sm:$0xff] %v279_v6 }
 0x136   : > { %563 = shalt.err (!%p560_p5)
}
 0x137   : > { %s564_s24 = scalar_lea.hbm %s824_s26, 128  ;;  %s568_s30 = scalar_lea.hbm %s875_s2, 256 }
 0x138   : > { %p565_p10 = scmp.ne.s32.totalorder %s824_s26, %s564_s24  ;;  %p569_p7 = scmp.lt.u32.totalorder %s824_s26, %s875_s2 }
 0x139   : > { %p570_p3 = scmp.lt.u32.totalorder %s568_s30, %s564_s24  ;;  %p572_p11 = scmp.lt.u32.totalorder %s564_s24, %s824_s26 }
 0x13a   : > { %p566_p1 = pnand %p565_p10, %p758_p13 }
 0x13b   : > { %p571_p4 = por %p570_p3, %p569_p7 }
 0x13c   : > { %p567_p2 = pneg %p566_p1 }
 0x13d   : > { %p573_p6 = por %p572_p11, %p571_p4 }
 0x13f   : > { %p574_p8 = pnand %p573_p6, %p567_p2 }
 0x141   : > { %577 = shalt.err (!%p574_p8)
}
 0x142   : > { %423 = dma.vmem_to_hbm [thread:$0]  (%p758_p13), %s826_s3, 128, %s824_s26, %s283_s8  }
 0x143 PF: > { %s311_s5 = sand.u32 1, %s616_s9   ;;  %p894_p9 = scmp.ne.s32.totalorder %s883_s20, 0 }
 0x144   : > { %p895_p12 = scmp.ge.s32.totalorder %s636_s14, 2  ;;  %s312_s7 = scalar_lea.sflag [#allocation4], %s311_s5 }
 0x146   : > { %p434_p0 = pnand %p895_p12, %p894_p9 }
 0x148   : > { %611 = dma.done.wait (!%p434_p0), %s312_s7, 128  }
 0x149   : > { %613 = vsyncadd (!%p434_p0), %s312_s7, 4294967168  ;;  %s19_s14 = sadd.s32 1, %s636_s14   ;;  %s896_s9 = smov %s620_s10 }
 0x14a   : > { %p16_p5 = scmp.ge.s32.totalorder %s19_s14, 4   ;;  %s897_s10 = smov %s624_s11 }
 0x14b   : > { %s898_s11 = smov %s766_s28  ;;  %s899_s12 = smov %s632_s13 }
 0x14c   : > { %s900_s13 = smov %s902_s25  ;;  %18 = sbr.rel (!%p16_p5) target bundleno = 7 (0x7), region = 78 }
 0x153   :  { %317 = vsyncpa [#allocation3], 1 }
 0x154   :  { %319 = vsyncpa [#allocation3 + $0x1], 1 }
 0x155   :  { %320 = vsyncpa [#allocation6], 1 }
 0x156   :  { %322 = vsyncpa [#allocation6 + $0x1], 1 }
 0x157   :  { %323 = vsyncpa [#allocation4], 1 }
 0x158   :  { %325 = vsyncpa [#allocation4 + $0x1], 1 }

</bundles_post_ra>
